<compile_context>
chip_gen: v6e
topology: v6e:2x2x1
jax: 0.10.0
libtpu: 0.0.40
codegen_flags: <defaults>
</compile_context>

<pallas_src>
import functools

import jax
import jax.numpy as jnp
from jax.experimental import pallas as pl
from jax.experimental.pallas import tpu as pltpu

LANE = 128
SUBLANE = 8


def _round_up(x, m):
    return (x + m - 1) // m * m


def _cdiv(a, b):
    return -(-a // b)


# --------------------------------------------------------------------------- #
# Kernel: the whole MLP on one row tile. Weights/biases are VMEM-resident.
# --------------------------------------------------------------------------- #
def _fused_mlp_kernel(x_ref, *refs, num_layers: int, compute_dtype):
    """refs = (w0, b0, w1, b1, ..., w_{L-1}, b_{L-1}, out)."""
    o_ref = refs[-1]
    h = x_ref[...].astype(jnp.float32)
    for i in range(num_layers):
        w_ref = refs[2 * i]
        b_ref = refs[2 * i + 1]
        lhs = h.astype(compute_dtype)  # no-op when compute_dtype == f32
        # MXU matmul with f32 accumulation; bias (1, N) broadcasts over rows.
        h = jnp.dot(lhs, w_ref[...], preferred_element_type=jnp.float32) + b_ref[...]
        if i < num_layers - 1:  # final layer has no activation
            h = jnp.tanh(h)
    o_ref[...] = h.astype(o_ref.dtype)


# --------------------------------------------------------------------------- #
# One-time parameter preparation (perf feedback #1: no per-call padding).
# --------------------------------------------------------------------------- #
def prepare_mlp_params(params, *, use_bf16=False):
    """Pad (and optionally bf16-cast) weights/biases ONCE, outside the hot path.

    params: list of (w: [K_i, N_i] f32, b: [N_i] f32) in layer order
            (w is the transpose of PyTorch's nn.Linear.weight, so y = x @ w + b).

    Only interior (hidden) feature boundaries are zero-padded to multiples of
    128; the network input dim and final output dim stay unpadded so the
    batch-streamed x/out DMAs keep their true byte size. Zero padding is exact
    (padded weight rows/cols and bias lanes are 0, tanh(0)=0).
    """
    num_layers = len(params)
    dims = [params[0][0].shape[0]] + [w.shape[1] for (w, _) in params]
    pdims = list(dims)
    for i in range(1, num_layers):  # pad hidden boundaries only
        pdims[i] = _round_up(dims[i], LANE)

    w_dtype = jnp.bfloat16 if use_bf16 else jnp.float32
    padded = []
    for i, (w, b) in enumerate(params):
        kin, nout = w.shape
        wp = (jnp.zeros((pdims[i], pdims[i + 1]), w_dtype)
              .at[:kin, :nout].set(w.astype(w_dtype)))
        bp = jnp.zeros((1, pdims[i + 1]), jnp.float32).at[0, :nout].set(b)
        padded.append((wp, bp))
    return padded


# --------------------------------------------------------------------------- #
# Tiling / VMEM sizing helpers.
# --------------------------------------------------------------------------- #
def _choose_row_tiling(M, *, sublane=SUBLANE, target_tm=512, split_threshold=16):
    """Pick (TM, Mp, grid_m). TM is a multiple of `sublane`, capped near
    `target_tm`; Mp = grid_m * TM never ~2x-pads M; grid_m >= 2 once
    M > split_threshold so v7x's two TensorCores can share the row grid."""
    mp8 = _round_up(M, sublane)
    n_tiles = max(_cdiv(mp8, target_tm), 1)
    if M > split_threshold:
        n_tiles = max(n_tiles, 2)
    tm = _round_up(_cdiv(mp8, n_tiles), sublane)
    grid_m = _cdiv(M, tm)
    mp = grid_m * tm
    return tm, mp, grid_m


def _vmem_limit_bytes(padded_params, tm, k, n_out, pdims):
    """Right-size the scoped-VMEM request instead of asking for all of it."""
    resident = 0
    for w, b in padded_params:
        # conservatively assume double-buffered residents (fallback path)
        resident += 2 * (w.size * w.dtype.itemsize + b.size * b.dtype.itemsize)
    streamed = 2 * 4 * (tm * k + tm * n_out)   # double-buffered x / out tiles (f32)
    live_act = 2 * 4 * tm * max(pdims)         # in-kernel live activations, generous
    need = resident + streamed + live_act
    # 2x margin + fixed headroom for compiler scratch; never exceed 48 MiB
    # (v7x has only 64 MiB physical VMEM per TensorCore).
    return int(min(max(2 * need + (8 << 20), 16 << 20), 48 << 20))


def _resident_spec(shape, single_buffer):
    """Grid-invariant operand (constant index_map): stays resident in VMEM.
    Single-buffer it when the jax version supports pipeline_mode."""
    if single_buffer and hasattr(pl, "Buffered"):
        try:
            return pl.BlockSpec(shape, lambda i: (0, 0),
                                pipeline_mode=pl.Buffered(1))
        except TypeError:
            pass
    return pl.BlockSpec(shape, lambda i: (0, 0))


# --------------------------------------------------------------------------- #
# Forward: one fused pallas_call over row tiles.
# --------------------------------------------------------------------------- #
def fused_mlp_pallas(x, padded_params, *, target_tm=512):
    """x: [M, K] f32; padded_params: output of prepare_mlp_params -> [M, N_out]."""
    M, K = x.shape
    num_layers = len(padded_params)
    w_dtype = padded_params[0][0].dtype
    use_bf16 = (w_dtype == jnp.bfloat16)
    pdims = [K] + [w.shape[1] for (w, _) in padded_params]
    n_out = pdims[-1]
    assert padded_params[0][0].shape[0] == K, "x feature dim mismatch"

    sublane = 16 if use_bf16 else SUBLANE  # bf16 sublane packing
    TM, Mp, grid_m = _choose_row_tiling(M, sublane=sublane, target_tm=target_tm)

    # Row-pad x only when needed (no lane padding on the streamed input).
    xp = x if Mp == M else jnp.zeros((Mp, K), x.dtype).at[:M].set(x)

    flat_params = []
    for (w, b) in padded_params:
        flat_params.extend([w, b])

    vmem_limit = _vmem_limit_bytes(padded_params, TM, K, n_out, pdims)

    def build(single_buffer_weights):
        in_specs = [pl.BlockSpec((TM, K), lambda i: (i, 0))]  # streamed x tile
        for li in range(num_layers):
            kp, np_ = pdims[li], pdims[li + 1]
            in_specs.append(_resident_spec((kp, np_), single_buffer_weights))
            in_specs.append(_resident_spec((1, np_), single_buffer_weights))
        return pl.pallas_call(
            functools.partial(_fused_mlp_kernel,
                              num_layers=num_layers,
                              compute_dtype=w_dtype),
            out_shape=jax.ShapeDtypeStruct((Mp, n_out), x.dtype),
            grid=(grid_m,),
            in_specs=in_specs,
            out_specs=pl.BlockSpec((TM, n_out), lambda i: (i, 0)),
            compiler_params=pltpu.CompilerParams(
                dimension_semantics=("parallel",),
                vmem_limit_bytes=vmem_limit,
            ),
        )

    try:
        out_padded = build(True)(xp, *flat_params)
    except Exception:
        # pl.Buffered(1) single-buffering not supported by this jax/backend:
        # fall back to default (double-buffered) resident operands.
        out_padded = build(False)(xp, *flat_params)

    return out_padded if Mp == M else out_padded[:M]


# --------------------------------------------------------------------------- #
# Parameter init matching nn.Linear, and the ModelArch forward.
# --------------------------------------------------------------------------- #
def init_mlp_params(layers, key):
    """PyTorch nn.Linear(in, out) stores weight as (out, in); we store the
    transpose (in, out) so the kernel computes x @ W + b directly."""
    params = []
    for idx in range(1, len(layers)):
        fan_in, fan_out = layers[idx - 1], layers[idx]
        key, wk, bk = jax.random.split(key, 3)
        bound = 1.0 / jnp.sqrt(jnp.float32(fan_in))
        w = jax.random.uniform(wk, (fan_in, fan_out), jnp.float32, -bound, bound)
        b = jax.random.uniform(bk, (fan_out,), jnp.float32, -bound, bound)
        params.append((w, b))
    return params


def model_arch_forward(prepared_params, x):
    """ModelArch forward: Sequential(Linear+Tanh, ..., Linear+Tanh, Linear)."""
    return fused_mlp_pallas(x, prepared_params)


if __name__ == "__main__":
    # layers spec as in ModelArch(layers): [in, hidden, hidden, out]
    layers = [16, 32, 32, 8]
    batch = 32  # > 16 so the row grid splits into 2 tiles (dual-TC path on v7x)

    key = jax.random.PRNGKey(0)
    key, xk = jax.random.split(key)
    x = jax.random.normal(xk, (batch, layers[0]), jnp.float32)

    params = init_mlp_params(layers, key)
    # Pad / stage parameters ONCE (perf feedback #1). use_bf16=True is the
    # optional v6e/v7x fast path; kept False here for exact f32 (and v5e).
    prepared = prepare_mlp_params(params, use_bf16=False)

    out = model_arch_forward(prepared, x)
    out = jax.block_until_ready(out)

    # sanity: pure-JAX reference of the same forward pass
    ref = x
    for i, (w, b) in enumerate(params):
        ref = ref @ w + b
        if i < len(params) - 1:
            ref = jnp.tanh(ref)
    assert out.shape == (batch, layers[-1])
    assert jnp.allclose(out, ref, atol=1e-5, rtol=1e-5)

    print("KERNEL_OK")
</pallas_src>

<mosaic_0001>
module attributes {stable_mosaic.version = 11 : i64} {
  func.func @_fused_mlp_kernel(%arg0: i32, %arg1: memref<16x16xf32, #tpu.memory_space<vmem>>, %arg2: memref<16x128xf32, #tpu.memory_space<vmem>>, %arg3: memref<1x128xf32, #tpu.memory_space<vmem>>, %arg4: memref<128x128xf32, #tpu.memory_space<vmem>>, %arg5: memref<1x128xf32, #tpu.memory_space<vmem>>, %arg6: memref<128x8xf32, #tpu.memory_space<vmem>>, %arg7: memref<1x8xf32, #tpu.memory_space<vmem>>, %arg8: memref<16x8xf32, #tpu.memory_space<vmem>>) attributes {dimension_semantics = [#tpu.dimension_semantics<parallel>], iteration_bounds = array<i64: 2>, scalar_prefetch = 0 : i64, scratch_operands = 0 : i64, tpu.core_type = #tpu.core_type<tc>, window_params = [{transform_indices = @transform_0, window_bounds = array<i64: 16, 16>}, {pipeline_mode = #tpu.pipeline_mode<synchronous>, transform_indices = @transform_1, window_bounds = array<i64: 16, 128>}, {pipeline_mode = #tpu.pipeline_mode<synchronous>, transform_indices = @transform_2, window_bounds = array<i64: 1, 128>}, {pipeline_mode = #tpu.pipeline_mode<synchronous>, transform_indices = @transform_3, window_bounds = array<i64: 128, 128>}, {pipeline_mode = #tpu.pipeline_mode<synchronous>, transform_indices = @transform_4, window_bounds = array<i64: 1, 128>}, {pipeline_mode = #tpu.pipeline_mode<synchronous>, transform_indices = @transform_5, window_bounds = array<i64: 128, 8>}, {pipeline_mode = #tpu.pipeline_mode<synchronous>, transform_indices = @transform_6, window_bounds = array<i64: 1, 8>}, {transform_indices = @transform_7, window_bounds = array<i64: 16, 8>}]} {
    %c0 = arith.constant 0 : index
    %c0_0 = arith.constant 0 : index
    %0 = vector.load %arg1[%c0, %c0_0] : memref<16x16xf32, #tpu.memory_space<vmem>>, vector<16x16xf32>
    %c0_1 = arith.constant 0 : index
    %c0_2 = arith.constant 0 : index
    %1 = vector.load %arg2[%c0_1, %c0_2] : memref<16x128xf32, #tpu.memory_space<vmem>>, vector<16x128xf32>
    %cst = arith.constant dense<0.000000e+00> : vector<16x128xf32>
    %2 = tpu.matmul %0, %1, %cst {dimension_numbers = #tpu.dot_dimension_numbers<[1], [0], [0], [1], [0, 0, 1, 1], [], []>} : vector<16x16xf32>, vector<16x128xf32>, vector<16x128xf32> -> vector<16x128xf32>
    %c0_3 = arith.constant 0 : index
    %c0_4 = arith.constant 0 : index
    %3 = vector.load %arg3[%c0_3, %c0_4] : memref<1x128xf32, #tpu.memory_space<vmem>>, vector<1x128xf32>
    %4 = vector.broadcast %3 : vector<1x128xf32> to vector<16x128xf32>
    %5 = arith.addf %2, %4 : vector<16x128xf32>
    %6 = math.tanh %5 : vector<16x128xf32>
    %c0_5 = arith.constant 0 : index
    %c0_6 = arith.constant 0 : index
    %7 = vector.load %arg4[%c0_5, %c0_6] : memref<128x128xf32, #tpu.memory_space<vmem>>, vector<128x128xf32>
    %cst_7 = arith.constant dense<0.000000e+00> : vector<16x128xf32>
    %8 = tpu.matmul %6, %7, %cst_7 {dimension_numbers = #tpu.dot_dimension_numbers<[1], [0], [0], [1], [0, 0, 1, 1], [], []>} : vector<16x128xf32>, vector<128x128xf32>, vector<16x128xf32> -> vector<16x128xf32>
    %c0_8 = arith.constant 0 : index
    %c0_9 = arith.constant 0 : index
    %9 = vector.load %arg5[%c0_8, %c0_9] : memref<1x128xf32, #tpu.memory_space<vmem>>, vector<1x128xf32>
    %10 = vector.broadcast %9 : vector<1x128xf32> to vector<16x128xf32>
    %11 = arith.addf %8, %10 : vector<16x128xf32>
    %12 = math.tanh %11 : vector<16x128xf32>
    %c0_10 = arith.constant 0 : index
    %c0_11 = arith.constant 0 : index
    %13 = vector.load %arg6[%c0_10, %c0_11] : memref<128x8xf32, #tpu.memory_space<vmem>>, vector<128x8xf32>
    %cst_12 = arith.constant dense<0.000000e+00> : vector<16x8xf32>
    %14 = tpu.matmul %12, %13, %cst_12 {dimension_numbers = #tpu.dot_dimension_numbers<[1], [0], [0], [1], [0, 0, 1, 1], [], []>} : vector<16x128xf32>, vector<128x8xf32>, vector<16x8xf32> -> vector<16x8xf32>
    %c0_13 = arith.constant 0 : index
    %c0_14 = arith.constant 0 : index
    %15 = vector.load %arg7[%c0_13, %c0_14] : memref<1x8xf32, #tpu.memory_space<vmem>>, vector<1x8xf32>
    %16 = vector.broadcast %15 : vector<1x8xf32> to vector<16x8xf32>
    %17 = arith.addf %14, %16 : vector<16x8xf32>
    %c0_15 = arith.constant 0 : index
    %c0_16 = arith.constant 0 : index
    %18 = vector.load %arg8[%c0_15, %c0_16] : memref<16x8xf32, #tpu.memory_space<vmem>>, vector<16x8xf32>
    tpu.vector_store %arg8[%c0_15, %c0_16], %17 {strides = array<i32>} : memref<16x8xf32, #tpu.memory_space<vmem>>, vector<16x8xf32>,
    return
  }
  func.func @transform_0(%arg0: i32) -> (i32, i32) {
    %c0_i32 = arith.constant 0 : i32
    %c0_i32_0 = arith.constant 0 : i32
    return %arg0, %c0_i32 : i32, i32
  }
  func.func @transform_1(%arg0: i32) -> (i32, i32) {
    %c0_i32 = arith.constant 0 : i32
    %c0_i32_0 = arith.constant 0 : i32
    %c0_i32_1 = arith.constant 0 : i32
    return %c0_i32, %c0_i32_0 : i32, i32
  }
  func.func @transform_2(%arg0: i32) -> (i32, i32) {
    %c0_i32 = arith.constant 0 : i32
    %c0_i32_0 = arith.constant 0 : i32
    %c0_i32_1 = arith.constant 0 : i32
    return %c0_i32, %c0_i32_0 : i32, i32
  }
  func.func @transform_3(%arg0: i32) -> (i32, i32) {
    %c0_i32 = arith.constant 0 : i32
    %c0_i32_0 = arith.constant 0 : i32
    %c0_i32_1 = arith.constant 0 : i32
    return %c0_i32, %c0_i32_0 : i32, i32
  }
  func.func @transform_4(%arg0: i32) -> (i32, i32) {
    %c0_i32 = arith.constant 0 : i32
    %c0_i32_0 = arith.constant 0 : i32
    %c0_i32_1 = arith.constant 0 : i32
    return %c0_i32, %c0_i32_0 : i32, i32
  }
  func.func @transform_5(%arg0: i32) -> (i32, i32) {
    %c0_i32 = arith.constant 0 : i32
    %c0_i32_0 = arith.constant 0 : i32
    %c0_i32_1 = arith.constant 0 : i32
    return %c0_i32, %c0_i32_0 : i32, i32
  }
  func.func @transform_6(%arg0: i32) -> (i32, i32) {
    %c0_i32 = arith.constant 0 : i32
    %c0_i32_0 = arith.constant 0 : i32
    %c0_i32_1 = arith.constant 0 : i32
    return %c0_i32, %c0_i32_0 : i32, i32
  }
  func.func @transform_7(%arg0: i32) -> (i32, i32) {
    %c0_i32 = arith.constant 0 : i32
    %c0_i32_0 = arith.constant 0 : i32
    return %arg0, %c0_i32 : i32, i32
  }
}

module attributes {stable_mosaic.version = 11 : i64} {
  func.func @_fused_mlp_kernel(%arg0: i32, %arg1: memref<16x16xf32, #tpu.memory_space<vmem>>, %arg2: memref<16x128xf32, #tpu.memory_space<vmem>>, %arg3: memref<1x128xf32, #tpu.memory_space<vmem>>, %arg4: memref<128x128xf32, #tpu.memory_space<vmem>>, %arg5: memref<1x128xf32, #tpu.memory_space<vmem>>, %arg6: memref<128x8xf32, #tpu.memory_space<vmem>>, %arg7: memref<1x8xf32, #tpu.memory_space<vmem>>, %arg8: memref<16x8xf32, #tpu.memory_space<vmem>>) attributes {dimension_semantics = [#tpu.dimension_semantics<parallel>], iteration_bounds = array<i64: 2>, scalar_prefetch = 0 : i64, scratch_operands = 0 : i64, tpu.core_type = #tpu.core_type<tc>, window_params = [{transform_indices = @transform_0, window_bounds = array<i64: 16, 16>}, {pipeline_mode = #tpu.pipeline_mode<synchronous>, transform_indices = @transform_1, window_bounds = array<i64: 16, 128>}, {pipeline_mode = #tpu.pipeline_mode<synchronous>, transform_indices = @transform_2, window_bounds = array<i64: 1, 128>}, {pipeline_mode = #tpu.pipeline_mode<synchronous>, transform_indices = @transform_3, window_bounds = array<i64: 128, 128>}, {pipeline_mode = #tpu.pipeline_mode<synchronous>, transform_indices = @transform_4, window_bounds = array<i64: 1, 128>}, {pipeline_mode = #tpu.pipeline_mode<synchronous>, transform_indices = @transform_5, window_bounds = array<i64: 128, 8>}, {pipeline_mode = #tpu.pipeline_mode<synchronous>, transform_indices = @transform_6, window_bounds = array<i64: 1, 8>}, {transform_indices = @transform_7, window_bounds = array<i64: 16, 8>}]} {
    %c0 = arith.constant 0 : index
    %c0_0 = arith.constant 0 : index
    %0 = vector.load %arg1[%c0, %c0_0] : memref<16x16xf32, #tpu.memory_space<vmem>>, vector<16x16xf32>
    %c0_1 = arith.constant 0 : index
    %c0_2 = arith.constant 0 : index
    %1 = vector.load %arg2[%c0_1, %c0_2] : memref<16x128xf32, #tpu.memory_space<vmem>>, vector<16x128xf32>
    %cst = arith.constant dense<0.000000e+00> : vector<16x128xf32>
    %2 = tpu.matmul %0, %1, %cst {dimension_numbers = #tpu.dot_dimension_numbers<[1], [0], [0], [1], [0, 0, 1, 1], [], []>} : vector<16x16xf32>, vector<16x128xf32>, vector<16x128xf32> -> vector<16x128xf32>
    %c0_3 = arith.constant 0 : index
    %c0_4 = arith.constant 0 : index
    %3 = vector.load %arg3[%c0_3, %c0_4] : memref<1x128xf32, #tpu.memory_space<vmem>>, vector<1x128xf32>
    %4 = vector.broadcast %3 : vector<1x128xf32> to vector<16x128xf32>
    %5 = arith.addf %2, %4 : vector<16x128xf32>
    %6 = math.tanh %5 : vector<16x128xf32>
    %c0_5 = arith.constant 0 : index
    %c0_6 = arith.constant 0 : index
    %7 = vector.load %arg4[%c0_5, %c0_6] : memref<128x128xf32, #tpu.memory_space<vmem>>, vector<128x128xf32>
    %cst_7 = arith.constant dense<0.000000e+00> : vector<16x128xf32>
    %8 = tpu.matmul %6, %7, %cst_7 {dimension_numbers = #tpu.dot_dimension_numbers<[1], [0], [0], [1], [0, 0, 1, 1], [], []>} : vector<16x128xf32>, vector<128x128xf32>, vector<16x128xf32> -> vector<16x128xf32>
    %c0_8 = arith.constant 0 : index
    %c0_9 = arith.constant 0 : index
    %9 = vector.load %arg5[%c0_8, %c0_9] : memref<1x128xf32, #tpu.memory_space<vmem>>, vector<1x128xf32>
    %10 = vector.broadcast %9 : vector<1x128xf32> to vector<16x128xf32>
    %11 = arith.addf %8, %10 : vector<16x128xf32>
    %12 = math.tanh %11 : vector<16x128xf32>
    %c0_10 = arith.constant 0 : index
    %c0_11 = arith.constant 0 : index
    %13 = vector.load %arg6[%c0_10, %c0_11] : memref<128x8xf32, #tpu.memory_space<vmem>>, vector<128x8xf32>
    %cst_12 = arith.constant dense<0.000000e+00> : vector<16x8xf32>
    %14 = tpu.matmul %12, %13, %cst_12 {dimension_numbers = #tpu.dot_dimension_numbers<[1], [0], [0], [1], [0, 0, 1, 1], [], []>} : vector<16x128xf32>, vector<128x8xf32>, vector<16x8xf32> -> vector<16x8xf32>
    %c0_13 = arith.constant 0 : index
    %c0_14 = arith.constant 0 : index
    %15 = vector.load %arg7[%c0_13, %c0_14] : memref<1x8xf32, #tpu.memory_space<vmem>>, vector<1x8xf32>
    %16 = vector.broadcast %15 : vector<1x8xf32> to vector<16x8xf32>
    %17 = arith.addf %14, %16 : vector<16x8xf32>
    %c0_15 = arith.constant 0 : index
    %c0_16 = arith.constant 0 : index
    %18 = vector.load %arg8[%c0_15, %c0_16] : memref<16x8xf32, #tpu.memory_space<vmem>>, vector<16x8xf32>
    tpu.vector_store %arg8[%c0_15, %c0_16], %17 {strides = array<i32>} : memref<16x8xf32, #tpu.memory_space<vmem>>, vector<16x8xf32>,
    return
  }
  func.func @transform_0(%arg0: i32) -> (i32, i32) {
    %c0_i32 = arith.constant 0 : i32
    %c0_i32_0 = arith.constant 0 : i32
    return %arg0, %c0_i32 : i32, i32
  }
  func.func @transform_1(%arg0: i32) -> (i32, i32) {
    %c0_i32 = arith.constant 0 : i32
    %c0_i32_0 = arith.constant 0 : i32
    %c0_i32_1 = arith.constant 0 : i32
    return %c0_i32, %c0_i32_0 : i32, i32
  }
  func.func @transform_2(%arg0: i32) -> (i32, i32) {
    %c0_i32 = arith.constant 0 : i32
    %c0_i32_0 = arith.constant 0 : i32
    %c0_i32_1 = arith.constant 0 : i32
    return %c0_i32, %c0_i32_0 : i32, i32
  }
  func.func @transform_3(%arg0: i32) -> (i32, i32) {
    %c0_i32 = arith.constant 0 : i32
    %c0_i32_0 = arith.constant 0 : i32
    %c0_i32_1 = arith.constant 0 : i32
    return %c0_i32, %c0_i32_0 : i32, i32
  }
  func.func @transform_4(%arg0: i32) -> (i32, i32) {
    %c0_i32 = arith.constant 0 : i32
    %c0_i32_0 = arith.constant 0 : i32
    %c0_i32_1 = arith.constant 0 : i32
    return %c0_i32, %c0_i32_0 : i32, i32
  }
  func.func @transform_5(%arg0: i32) -> (i32, i32) {
    %c0_i32 = arith.constant 0 : i32
    %c0_i32_0 = arith.constant 0 : i32
    %c0_i32_1 = arith.constant 0 : i32
    return %c0_i32, %c0_i32_0 : i32, i32
  }
  func.func @transform_6(%arg0: i32) -> (i32, i32) {
    %c0_i32 = arith.constant 0 : i32
    %c0_i32_0 = arith.constant 0 : i32
    %c0_i32_1 = arith.constant 0 : i32
    return %c0_i32, %c0_i32_0 : i32, i32
  }
  func.func @transform_7(%arg0: i32) -> (i32, i32) {
    %c0_i32 = arith.constant 0 : i32
    %c0_i32_0 = arith.constant 0 : i32
    return %arg0, %c0_i32 : i32, i32
  }
}

</mosaic_0001>

<bundles_post_ra>
// kernel: tpu_custom_call.1
= control target key start
LH: loop header
LB: loop body
LE: loop exit
PB: predicated region body
PF: predicated region fallthrough
CT: control target
= control target key end

     0   :  { %s831_s24 = smov 0   ;;  %s966_s0 = inlined_call_operand.vmem [shape: f32[32,16], index: 0, kind: input, shape index: {}]   ;;  %s967_s1 = inlined_call_operand.vmem [shape: f32[16,128], index: 1, kind: input, shape index: {}]   ;;  %s968_s2 = inlined_call_operand.vmem [shape: f32[1,128], index: 2, kind: input, shape index: {}]   ;;  %s969_s3 = inlined_call_operand.vmem [shape: f32[128,128], index: 3, kind: input, shape index: {}]   ;;  %s970_s4 = inlined_call_operand.vmem [shape: f32[1,128], index: 4, kind: input, shape index: {}]   ;;  %s971_s5 = inlined_call_operand.vmem [shape: f32[128,8], index: 5, kind: input, shape index: {}]   ;;  %s972_s6 = inlined_call_operand.vmem [shape: f32[1,8], index: 6, kind: input, shape index: {}]   ;;  %s973_s7 = inlined_call_operand.vmem [shape: f32[32,8], index: 7, kind: output, shape index: {}]  }
   0x1 LB: > { %s634_s25 = sadd.s32 4294967295, %s789_s24   ;;  %p638_p0 = scmp.ge.s32.totalorder %s789_s24, 1  ;;  %s789_s24 = sphi %s831_s24, %s17_s24  }
   0x2   : > { %p238_p1 = scmp.lt.s32.totalorder %s789_s24, 3 }
   0x4   : > { %p239_p2 = pnand %p638_p0, %p238_p1 }
   0x5   : > { %s639_s30 = sshll.u32 (!%p239_p2), %s634_s25, 1 }
   0x6   : > { %242 = sbr.rel (%p239_p2) target bundleno = 639 (0x27f), region = 48  ;;  %p271_p3 = scmp.lt.s32.totalorder (!%p239_p2), %s639_s30, 3 }
   0xb   : > { %v285_v0 = vld [vmem:[%s967_s1 + $0x8] sm:$0xff]  ;;  %v284_v1 = vld [vmem:[%s967_s1] sm:$0xff]  ;;  %v392_v2 = vld [vmem:[%s969_s3 + $0x78] sm:$0xff]  ;;  %s975_s30 = smov (!%p271_p3, %s639_s30), 3  ;;  %vm293_vm0 = vcmask 130048   ;;  %vm575_vm1 = vcmask 64512  }
   0xc   : > { %690 = vmatprep.subr.mxu0 %v285_v0  ;;  %697 = vmatprep.subr.mxu1 %v392_v2  ;;  %v391_v3 = vld [vmem:[%s969_s3 + $0x70] sm:$0xff]  ;;  %v390_v4 = vld [vmem:[%s969_s3 + $0x68] sm:$0xff]  ;;  %v389_v5 = vld [vmem:[%s969_s3 + $0x60] sm:$0xff]  ;;  %s640_s16 = sshll.u32 %s975_s30, 3 }
   0xd   : > { %691 = vmatpush3.msra.mxu0 %v285_v0  ;;  %698 = vmatpush3.msra.mxu1 %v392_v2  ;;  %s274_s19 = scalar_lea.vmem %s966_s0, %s640_s16  ;;  %v388_v6 = vld [vmem:[%s969_s3 + $0x58] sm:$0xff]  ;;  %v387_v9 = vld [vmem:[%s969_s3 + $0x50] sm:$0xff]  ;;  %v386_v10 = vld [vmem:[%s969_s3 + $0x48] sm:$0xff]  ;;  %s280_s25 = scalar_lea.vmem %s973_s7, %s640_s16 }
   0xe   : > { %692 = vmatprep.subr.mxu0 %v284_v1  ;;  %699 = vmatprep.subr.mxu1 %v391_v3  ;;  %v282_v7 = vld [vmem:[%s274_s19] sm:$0xff]  ;;  %v283_v8 = vld [vmem:[%s274_s19 + $0x8] sm:$0xff]  ;;  %v384_v12 = vld [vmem:[%s969_s3 + $0x38] sm:$0xff] }
   0xf   : > { %693 = vmatpush3.msra.mxu0 %v284_v1  ;;  %700 = vmatpush3.msra.mxu1 %v391_v3  ;;  %v385_v11 = vld [vmem:[%s969_s3 + $0x40] sm:$0xff]  ;;  %v383_v13 = vld [vmem:[%s969_s3 + $0x30] sm:$0xff]  ;;  %v382_v14 = vld [vmem:[%s969_s3 + $0x28] sm:$0xff] }
  0x10   : > { %701 = vmatprep.subr.mxu1 %v390_v4  ;;  %694 = vmatprep.mubr.msk.f32.mxu0 %vm293_vm0, %v282_v7  ;;  %v381_v15 = vld [vmem:[%s969_s3 + $0x20] sm:$0xff]  ;;  %v380_v16 = vld [vmem:[%s969_s3 + $0x18] sm:$0xff]  ;;  %v379_v17 = vld [vmem:[%s969_s3 + $0x10] sm:$0xff] }
  0x11   : > { %702 = vmatpush3.msra.mxu1 %v390_v4  ;;  %695 = vmatmul.mubr.msk.f32.vlgmr.msra.gmra.mxu0 %vm293_vm0, %v283_v8  ;;  %v378_v18 = vld [vmem:[%s969_s3 + $0x8] sm:$0xff]  ;;  %v377_v19 = vld [vmem:[%s969_s3] sm:$0xff]  ;;  %v492_v20 = vld [vmem:[%s971_s5 + $0x78] sm:$0xff] }
  0x12   : > { %703 = vmatprep.subr.mxu1 %v389_v5  ;;  %v491_v21 = vld [vmem:[%s971_s5 + $0x70] sm:$0xff]  ;;  %732 = vmatprep.subr.mxu0 %v492_v20  ;;  %v490_v22 = vld [vmem:[%s971_s5 + $0x68] sm:$0xff]  ;;  %v489_v23 = vld [vmem:[%s971_s5 + $0x60] sm:$0xff] }
  0x13   : > { %704 = vmatpush3.msra.mxu1 %v389_v5  ;;  %733 = vmatpush3.msra.mxu0 %v492_v20  ;;  %v488_v24 = vld [vmem:[%s971_s5 + $0x58] sm:$0xff]  ;;  %v487_v25 = vld [vmem:[%s971_s5 + $0x50] sm:$0xff]  ;;  %v643_v26 = vld [vmem:[%s968_s2] ss:$0 sm:$0xff] }
  0x14   : > { %705 = vmatprep.subr.mxu1 %v388_v6  ;;  %734 = vmatprep.subr.mxu0 %v491_v21  ;;  %v486_v33 = vld [vmem:[%s971_s5 + $0x48] sm:$0xff]  ;;  %v485_v34 = vld [vmem:[%s971_s5 + $0x40] sm:$0xff]  ;;  %v484_v35 = vld [vmem:[%s971_s5 + $0x38] sm:$0xff] }
  0x15   : > { %706 = vmatpush3.msra.mxu1 %v388_v6  ;;  %735 = vmatpush3.msra.mxu0 %v491_v21  ;;  %v483_v36 = vld [vmem:[%s971_s5 + $0x30] sm:$0xff]  ;;  %v482_v37 = vld [vmem:[%s971_s5 + $0x28] sm:$0xff]  ;;  %v481_v38 = vld [vmem:[%s971_s5 + $0x20] sm:$0xff] }
  0x16   : > { %707 = vmatprep.subr.mxu1 %v387_v9  ;;  %736 = vmatprep.subr.mxu0 %v490_v22  ;;  %v480_v39 = vld [vmem:[%s971_s5 + $0x18] sm:$0xff]  ;;  %v479_v40 = vld [vmem:[%s971_s5 + $0x10] sm:$0xff]  ;;  %v478_v41 = vld [vmem:[%s971_s5 + $0x8] sm:$0xff] }
  0x17   : > { %708 = vmatpush3.msra.mxu1 %v387_v9  ;;  %737 = vmatpush3.msra.mxu0 %v490_v22  ;;  %v477_v42 = vld [vmem:[%s971_s5] sm:$0xff] }
  0x18   : > { %709 = vmatprep.subr.mxu1 %v386_v10  ;;  %738 = vmatprep.subr.mxu0 %v489_v23  ;;  %v646_v43 = vld [vmem:[%s970_s4] ss:$0 sm:$0xff] }
  0x19   : > { %710 = vmatpush3.msra.mxu1 %v386_v10  ;;  %739 = vmatpush3.msra.mxu0 %v489_v23  ;;  %v647_v51 = vld [vmem:[%s972_s6] ss:$0 sm:$0xff] }
  0x1a   : > { %711 = vmatprep.subr.mxu1 %v385_v11  ;;  %740 = vmatprep.subr.mxu0 %v488_v24 }
  0x1b   : > { %712 = vmatpush3.msra.mxu1 %v385_v11  ;;  %741 = vmatpush3.msra.mxu0 %v488_v24 }
  0x1c   : > { %713 = vmatprep.subr.mxu1 %v384_v12  ;;  %742 = vmatprep.subr.mxu0 %v487_v25 }
  0x1d   : > { %714 = vmatpush3.msra.mxu1 %v384_v12  ;;  %743 = vmatpush3.msra.mxu0 %v487_v25 }
  0x1e   : > { %715 = vmatprep.subr.mxu1 %v383_v13  ;;  %744 = vmatprep.subr.mxu0 %v486_v33 }
  0x1f   : > { %716 = vmatpush3.msra.mxu1 %v383_v13  ;;  %745 = vmatpush3.msra.mxu0 %v486_v33 }
  0x20   : > { %717 = vmatprep.subr.mxu1 %v382_v14  ;;  %746 = vmatprep.subr.mxu0 %v485_v34 }
  0x21   : > { %718 = vmatpush3.msra.mxu1 %v382_v14  ;;  %747 = vmatpush3.msra.mxu0 %v485_v34 }
  0x22   : > { %719 = vmatprep.subr.mxu1 %v381_v15  ;;  %748 = vmatprep.subr.mxu0 %v484_v35 }
  0x23   : > { %720 = vmatpush3.msra.mxu1 %v381_v15  ;;  %749 = vmatpush3.msra.mxu0 %v484_v35 }
  0x24   : > { %721 = vmatprep.subr.mxu1 %v380_v16  ;;  %750 = vmatprep.subr.mxu0 %v483_v36 }
  0x25   : > { %722 = vmatpush3.msra.mxu1 %v380_v16  ;;  %751 = vmatpush3.msra.mxu0 %v483_v36 }
  0x26   : > { %723 = vmatprep.subr.mxu1 %v379_v17  ;;  %752 = vmatprep.subr.mxu0 %v482_v37 }
  0x27   : > { %724 = vmatpush3.msra.mxu1 %v379_v17  ;;  %753 = vmatpush3.msra.mxu0 %v482_v37 }
  0x28   : > { %725 = vmatprep.subr.mxu1 %v378_v18  ;;  %754 = vmatprep.subr.mxu0 %v481_v38 }
  0x29   : > { %726 = vmatpush3.msra.mxu1 %v378_v18  ;;  %755 = vmatpush3.msra.mxu0 %v481_v38 }
  0x2a   : > { %727 = vmatprep.subr.mxu1 %v377_v19  ;;  %756 = vmatprep.subr.mxu0 %v480_v39 }
  0x2b   : > { %728 = vmatpush3.msra.mxu1 %v377_v19  ;;  %757 = vmatpush3.msra.mxu0 %v480_v39 }
  0x2c   : > { %758 = vmatprep.subr.mxu0 %v479_v40 }
  0x2d   : > { %759 = vmatpush3.msra.mxu0 %v479_v40 }
  0x2e   : > { %760 = vmatprep.subr.mxu0 %v478_v41 }
  0x2f   : > { %761 = vmatpush3.msra.mxu0 %v478_v41 }
  0x30   : > { %762 = vmatprep.subr.mxu0 %v477_v42 }
  0x31   : > { %763 = vmatpush3.msra.mxu0 %v477_v42 }
  0xd1   : > { %v696_v27 = vpop.f32.mrf.mxu0 }
  0xd2   : > { %v372_v28 = vadd.f32 %v696_v27, %v643_v26 }
  0xd3   : > { %v366_v29 = vpop.f32.mrf.mxu0 }
  0xd4   : > { %v367_v30 = vadd.f32 %v643_v26, %v366_v29 }
  0xd6   : > { %775 = vtanh.f32 %v367_v30 }
  0xd7   : > { %777 = vtanh.f32 %v372_v28 }
  0xe3   : > { %v776_v31 = vpop.eup %775 }
  0xe4   : > { %v778_v32 = vpop.eup %777  ;;  %729 = vmatprep.mubr.f32.mxu1 %v776_v31 }
  0xe5   : > { %730 = vmatmul.mubr.f32.vlgmr.msra.gmra.mxu1 %v778_v32 }
 0x1a5   : > { %v731_v44 = vpop.f32.mrf.mxu1 }
 0x1a6   : > { %v472_v45 = vadd.f32 %v731_v44, %v646_v43 }
 0x1a7   : > { %v466_v46 = vpop.f32.mrf.mxu1 }
 0x1a8   : > { %v467_v47 = vadd.f32 %v646_v43, %v466_v46 }
 0x1aa   : > { %779 = vtanh.f32 %v467_v47 }
 0x1ab   : > { %781 = vtanh.f32 %v472_v45 }
 0x1b7   : > { %v780_v48 = vpop.eup %779 }
 0x1b8   : > { %v782_v49 = vpop.eup %781  ;;  %764 = vmatprep.mubr.f32.mxu0 %v780_v48 }
 0x1b9   : > { %765 = vmatmul.mubr.f32.vlgmr.msra.gmra.mxu0 %v782_v49 }
 0x279   : > { %v766_v50 = vpop.f32.mrf.mxu0 }
 0x27a   : > { %v572_v54 = vadd.f32 %v766_v50, %v647_v51 }
 0x27b   : > { %v566_v52 = vpop.f32.mrf.mxu0 }
 0x27c   : > { %v567_v53 = vadd.f32 %v647_v51, %v566_v52  ;;  %577 = vst.msk [vmem:[%s280_s25 + $0x8] sm:$0xff] %vm575_vm1, %v572_v54 }
 0x27e   : > { %576 = vst.msk [vmem:[%s280_s25] sm:$0xff] %vm575_vm1, %v567_v53 }
 0x27f PF: > { %s17_s24 = sadd.s32 1, %s789_s24  }
 0x280   : > { %p14_p4 = scmp.ge.s32.totalorder %s17_s24, 4  }
 0x282   :  { %16 = sbr.rel (!%p14_p4) target bundleno = 1 (0x1), region = 78 }

// kernel: tpu_custom_call.1
= control target key start
LH: loop header
LB: loop body
LE: loop exit
PB: predicated region body
PF: predicated region fallthrough
CT: control target
= control target key end

     0   :  { %s831_s24 = smov 0   ;;  %s966_s0 = inlined_call_operand.vmem [shape: f32[32,16], index: 0, kind: input, shape index: {}]   ;;  %s967_s1 = inlined_call_operand.vmem [shape: f32[16,128], index: 1, kind: input, shape index: {}]   ;;  %s968_s2 = inlined_call_operand.vmem [shape: f32[1,128], index: 2, kind: input, shape index: {}]   ;;  %s969_s3 = inlined_call_operand.vmem [shape: f32[128,128], index: 3, kind: input, shape index: {}]   ;;  %s970_s4 = inlined_call_operand.vmem [shape: f32[1,128], index: 4, kind: input, shape index: {}]   ;;  %s971_s5 = inlined_call_operand.vmem [shape: f32[128,8], index: 5, kind: input, shape index: {}]   ;;  %s972_s6 = inlined_call_operand.vmem [shape: f32[1,8], index: 6, kind: input, shape index: {}]   ;;  %s973_s7 = inlined_call_operand.vmem [shape: f32[32,8], index: 7, kind: output, shape index: {}]  }
   0x1 LB: > { %s634_s25 = sadd.s32 4294967295, %s789_s24   ;;  %p638_p0 = scmp.ge.s32.totalorder %s789_s24, 1  ;;  %s789_s24 = sphi %s831_s24, %s17_s24  }
   0x2   : > { %p238_p1 = scmp.lt.s32.totalorder %s789_s24, 3 }
   0x4   : > { %p239_p2 = pnand %p638_p0, %p238_p1 }
   0x5   : > { %s639_s30 = sshll.u32 (!%p239_p2), %s634_s25, 1 }
   0x6   : > { %242 = sbr.rel (%p239_p2) target bundleno = 639 (0x27f), region = 48  ;;  %p271_p3 = scmp.lt.s32.totalorder (!%p239_p2), %s639_s30, 3 }
   0xb   : > { %v285_v0 = vld [vmem:[%s967_s1 + $0x8] sm:$0xff]  ;;  %v284_v1 = vld [vmem:[%s967_s1] sm:$0xff]  ;;  %v392_v2 = vld [vmem:[%s969_s3 + $0x78] sm:$0xff]  ;;  %s975_s30 = smov (!%p271_p3, %s639_s30), 3  ;;  %vm293_vm0 = vcmask 130048   ;;  %vm575_vm1 = vcmask 64512  }
   0xc   : > { %690 = vmatprep.subr.mxu0 %v285_v0  ;;  %697 = vmatprep.subr.mxu1 %v392_v2  ;;  %v391_v3 = vld [vmem:[%s969_s3 + $0x70] sm:$0xff]  ;;  %v390_v4 = vld [vmem:[%s969_s3 + $0x68] sm:$0xff]  ;;  %v389_v5 = vld [vmem:[%s969_s3 + $0x60] sm:$0xff]  ;;  %s640_s16 = sshll.u32 %s975_s30, 3 }
   0xd   : > { %691 = vmatpush3.msra.mxu0 %v285_v0  ;;  %698 = vmatpush3.msra.mxu1 %v392_v2  ;;  %s274_s19 = scalar_lea.vmem %s966_s0, %s640_s16  ;;  %v388_v6 = vld [vmem:[%s969_s3 + $0x58] sm:$0xff]  ;;  %v387_v9 = vld [vmem:[%s969_s3 + $0x50] sm:$0xff]  ;;  %v386_v10 = vld [vmem:[%s969_s3 + $0x48] sm:$0xff]  ;;  %s280_s25 = scalar_lea.vmem %s973_s7, %s640_s16 }
   0xe   : > { %692 = vmatprep.subr.mxu0 %v284_v1  ;;  %699 = vmatprep.subr.mxu1 %v391_v3  ;;  %v282_v7 = vld [vmem:[%s274_s19] sm:$0xff]  ;;  %v283_v8 = vld [vmem:[%s274_s19 + $0x8] sm:$0xff]  ;;  %v384_v12 = vld [vmem:[%s969_s3 + $0x38] sm:$0xff] }
   0xf   : > { %693 = vmatpush3.msra.mxu0 %v284_v1  ;;  %700 = vmatpush3.msra.mxu1 %v391_v3  ;;  %v385_v11 = vld [vmem:[%s969_s3 + $0x40] sm:$0xff]  ;;  %v383_v13 = vld [vmem:[%s969_s3 + $0x30] sm:$0xff]  ;;  %v382_v14 = vld [vmem:[%s969_s3 + $0x28] sm:$0xff] }
  0x10   : > { %701 = vmatprep.subr.mxu1 %v390_v4  ;;  %694 = vmatprep.mubr.msk.f32.mxu0 %vm293_vm0, %v282_v7  ;;  %v381_v15 = vld [vmem:[%s969_s3 + $0x20] sm:$0xff]  ;;  %v380_v16 = vld [vmem:[%s969_s3 + $0x18] sm:$0xff]  ;;  %v379_v17 = vld [vmem:[%s969_s3 + $0x10] sm:$0xff] }
  0x11   : > { %702 = vmatpush3.msra.mxu1 %v390_v4  ;;  %695 = vmatmul.mubr.msk.f32.vlgmr.msra.gmra.mxu0 %vm293_vm0, %v283_v8  ;;  %v378_v18 = vld [vmem:[%s969_s3 + $0x8] sm:$0xff]  ;;  %v377_v19 = vld [vmem:[%s969_s3] sm:$0xff]  ;;  %v492_v20 = vld [vmem:[%s971_s5 + $0x78] sm:$0xff] }
  0x12   : > { %703 = vmatprep.subr.mxu1 %v389_v5  ;;  %v491_v21 = vld [vmem:[%s971_s5 + $0x70] sm:$0xff]  ;;  %732 = vmatprep.subr.mxu0 %v492_v20  ;;  %v490_v22 = vld [vmem:[%s971_s5 + $0x68] sm:$0xff]  ;;  %v489_v23 = vld [vmem:[%s971_s5 + $0x60] sm:$0xff] }
  0x13   : > { %704 = vmatpush3.msra.mxu1 %v389_v5  ;;  %733 = vmatpush3.msra.mxu0 %v492_v20  ;;  %v488_v24 = vld [vmem:[%s971_s5 + $0x58] sm:$0xff]  ;;  %v487_v25 = vld [vmem:[%s971_s5 + $0x50] sm:$0xff]  ;;  %v643_v26 = vld [vmem:[%s968_s2] ss:$0 sm:$0xff] }
  0x14   : > { %705 = vmatprep.subr.mxu1 %v388_v6  ;;  %734 = vmatprep.subr.mxu0 %v491_v21  ;;  %v486_v33 = vld [vmem:[%s971_s5 + $0x48] sm:$0xff]  ;;  %v485_v34 = vld [vmem:[%s971_s5 + $0x40] sm:$0xff]  ;;  %v484_v35 = vld [vmem:[%s971_s5 + $0x38] sm:$0xff] }
  0x15   : > { %706 = vmatpush3.msra.mxu1 %v388_v6  ;;  %735 = vmatpush3.msra.mxu0 %v491_v21  ;;  %v483_v36 = vld [vmem:[%s971_s5 + $0x30] sm:$0xff]  ;;  %v482_v37 = vld [vmem:[%s971_s5 + $0x28] sm:$0xff]  ;;  %v481_v38 = vld [vmem:[%s971_s5 + $0x20] sm:$0xff] }
  0x16   : > { %707 = vmatprep.subr.mxu1 %v387_v9  ;;  %736 = vmatprep.subr.mxu0 %v490_v22  ;;  %v480_v39 = vld [vmem:[%s971_s5 + $0x18] sm:$0xff]  ;;  %v479_v40 = vld [vmem:[%s971_s5 + $0x10] sm:$0xff]  ;;  %v478_v41 = vld [vmem:[%s971_s5 + $0x8] sm:$0xff] }
  0x17   : > { %708 = vmatpush3.msra.mxu1 %v387_v9  ;;  %737 = vmatpush3.msra.mxu0 %v490_v22  ;;  %v477_v42 = vld [vmem:[%s971_s5] sm:$0xff] }
  0x18   : > { %709 = vmatprep.subr.mxu1 %v386_v10  ;;  %738 = vmatprep.subr.mxu0 %v489_v23  ;;  %v646_v43 = vld [vmem:[%s970_s4] ss:$0 sm:$0xff] }
  0x19   : > { %710 = vmatpush3.msra.mxu1 %v386_v10  ;;  %739 = vmatpush3.msra.mxu0 %v489_v23  ;;  %v647_v51 = vld [vmem:[%s972_s6] ss:$0 sm:$0xff] }
  0x1a   : > { %711 = vmatprep.subr.mxu1 %v385_v11  ;;  %740 = vmatprep.subr.mxu0 %v488_v24 }
  0x1b   : > { %712 = vmatpush3.msra.mxu1 %v385_v11  ;;  %741 = vmatpush3.msra.mxu0 %v488_v24 }
  0x1c   : > { %713 = vmatprep.subr.mxu1 %v384_v12  ;;  %742 = vmatprep.subr.mxu0 %v487_v25 }
  0x1d   : > { %714 = vmatpush3.msra.mxu1 %v384_v12  ;;  %743 = vmatpush3.msra.mxu0 %v487_v25 }
  0x1e   : > { %715 = vmatprep.subr.mxu1 %v383_v13  ;;  %744 = vmatprep.subr.mxu0 %v486_v33 }
  0x1f   : > { %716 = vmatpush3.msra.mxu1 %v383_v13  ;;  %745 = vmatpush3.msra.mxu0 %v486_v33 }
  0x20   : > { %717 = vmatprep.subr.mxu1 %v382_v14  ;;  %746 = vmatprep.subr.mxu0 %v485_v34 }
  0x21   : > { %718 = vmatpush3.msra.mxu1 %v382_v14  ;;  %747 = vmatpush3.msra.mxu0 %v485_v34 }
  0x22   : > { %719 = vmatprep.subr.mxu1 %v381_v15  ;;  %748 = vmatprep.subr.mxu0 %v484_v35 }
  0x23   : > { %720 = vmatpush3.msra.mxu1 %v381_v15  ;;  %749 = vmatpush3.msra.mxu0 %v484_v35 }
  0x24   : > { %721 = vmatprep.subr.mxu1 %v380_v16  ;;  %750 = vmatprep.subr.mxu0 %v483_v36 }
  0x25   : > { %722 = vmatpush3.msra.mxu1 %v380_v16  ;;  %751 = vmatpush3.msra.mxu0 %v483_v36 }
  0x26   : > { %723 = vmatprep.subr.mxu1 %v379_v17  ;;  %752 = vmatprep.subr.mxu0 %v482_v37 }
  0x27   : > { %724 = vmatpush3.msra.mxu1 %v379_v17  ;;  %753 = vmatpush3.msra.mxu0 %v482_v37 }
  0x28   : > { %725 = vmatprep.subr.mxu1 %v378_v18  ;;  %754 = vmatprep.subr.mxu0 %v481_v38 }
  0x29   : > { %726 = vmatpush3.msra.mxu1 %v378_v18  ;;  %755 = vmatpush3.msra.mxu0 %v481_v38 }
  0x2a   : > { %727 = vmatprep.subr.mxu1 %v377_v19  ;;  %756 = vmatprep.subr.mxu0 %v480_v39 }
  0x2b   : > { %728 = vmatpush3.msra.mxu1 %v377_v19  ;;  %757 = vmatpush3.msra.mxu0 %v480_v39 }
  0x2c   : > { %758 = vmatprep.subr.mxu0 %v479_v40 }
  0x2d   : > { %759 = vmatpush3.msra.mxu0 %v479_v40 }
  0x2e   : > { %760 = vmatprep.subr.mxu0 %v478_v41 }
  0x2f   : > { %761 = vmatpush3.msra.mxu0 %v478_v41 }
  0x30   : > { %762 = vmatprep.subr.mxu0 %v477_v42 }
  0x31   : > { %763 = vmatpush3.msra.mxu0 %v477_v42 }
  0xd1   : > { %v696_v27 = vpop.f32.mrf.mxu0 }
  0xd2   : > { %v372_v28 = vadd.f32 %v696_v27, %v643_v26 }
  0xd3   : > { %v366_v29 = vpop.f32.mrf.mxu0 }
  0xd4   : > { %v367_v30 = vadd.f32 %v643_v26, %v366_v29 }
  0xd6   : > { %775 = vtanh.f32 %v367_v30 }
  0xd7   : > { %777 = vtanh.f32 %v372_v28 }
  0xe3   : > { %v776_v31 = vpop.eup %775 }
  0xe4   : > { %v778_v32 = vpop.eup %777  ;;  %729 = vmatprep.mubr.f32.mxu1 %v776_v31 }
  0xe5   : > { %730 = vmatmul.mubr.f32.vlgmr.msra.gmra.mxu1 %v778_v32 }
 0x1a5   : > { %v731_v44 = vpop.f32.mrf.mxu1 }
 0x1a6   : > { %v472_v45 = vadd.f32 %v731_v44, %v646_v43 }
 0x1a7   : > { %v466_v46 = vpop.f32.mrf.mxu1 }
 0x1a8   : > { %v467_v47 = vadd.f32 %v646_v43, %v466_v46 }
 0x1aa   : > { %779 = vtanh.f32 %v467_v47 }
 0x1ab   : > { %781 = vtanh.f32 %v472_v45 }
 0x1b7   : > { %v780_v48 = vpop.eup %779 }
 0x1b8   : > { %v782_v49 = vpop.eup %781  ;;  %764 = vmatprep.mubr.f32.mxu0 %v780_v48 }
 0x1b9   : > { %765 = vmatmul.mubr.f32.vlgmr.msra.gmra.mxu0 %v782_v49 }
 0x279   : > { %v766_v50 = vpop.f32.mrf.mxu0 }
 0x27a   : > { %v572_v54 = vadd.f32 %v766_v50, %v647_v51 }
 0x27b   : > { %v566_v52 = vpop.f32.mrf.mxu0 }
 0x27c   : > { %v567_v53 = vadd.f32 %v647_v51, %v566_v52  ;;  %577 = vst.msk [vmem:[%s280_s25 + $0x8] sm:$0xff] %vm575_vm1, %v572_v54 }
 0x27e   : > { %576 = vst.msk [vmem:[%s280_s25] sm:$0xff] %vm575_vm1, %v567_v53 }
 0x27f PF: > { %s17_s24 = sadd.s32 1, %s789_s24  }
 0x280   : > { %p14_p4 = scmp.ge.s32.totalorder %s17_s24, 4  }
 0x282   :  { %16 = sbr.rel (!%p14_p4) target bundleno = 1 (0x1), region = 78 }

</bundles_post_ra>
